<compile_context>
chip_gen: v5e
topology: v5e:2x2
jax: 0.10.0
libtpu: 0.0.40
codegen_flags: <defaults>
</compile_context>

<pallas_src>
import jax
import jax.numpy as jnp
from jax.experimental import pallas as pl
from jax.experimental.pallas import tpu as pltpu


def _round_up(a: int, b: int) -> int:
    return (a + b - 1) // b * b


def _soft_xent_kernel(x_ref, y_ref, out_ref):
    """One (block_n, C) tile -> per-row loss (block_n, 1), all rows independent.

    Uses  -sum(y * (x - m - lse)) == (m + lse) * sum(y) - sum(y * x),
    so only max / exp-sum / two weighted sums touch full-tile data (no log_p
    or y*log_p temporaries).  Rows are fully independent, so garbage rows in
    a partial edge block are harmless (their output rows are dropped on
    writeback) — do not add any cross-row operation here.
    """
    x = x_ref[...].astype(jnp.float32)
    y = y_ref[...].astype(jnp.float32)

    m = jnp.max(x, axis=-1, keepdims=True)                       # (bn, 1)
    lse = jnp.log(jnp.sum(jnp.exp(x - m), axis=-1, keepdims=True))
    sum_y = jnp.sum(y, axis=-1, keepdims=True)
    sum_yx = jnp.sum(y * x, axis=-1, keepdims=True)

    out_ref[...] = (m + lse) * sum_y - sum_yx


def _make_in_spec(block_shape, index_map, deep_pipeline):
    """BlockSpec with 3-deep buffering when the grid is long enough."""
    if deep_pipeline:
        try:
            return pl.BlockSpec(block_shape, index_map,
                                pipeline_mode=pl.Buffered(3))
        except TypeError:  # pipeline_mode not supported -> default 2-deep
            pass
    return pl.BlockSpec(block_shape, index_map)


def soft_cross_entropy_loss(x, y, *, block_n=None, max_block_n=1024):
    """Pallas implementation of SoftCrossEntropyLoss.forward(x, y)."""
    N, C = x.shape
    assert y.shape == (N, C)

    # ---- VMEM-aware batch-tile selection ------------------------------------
    # Physical lane footprint per row (last dim pads to 128 lanes in VMEM).
    c_phys = max(128, _round_up(C, 128))
    try:
        vmem_cap = int(getattr(pltpu.get_tpu_info(), "vmem_capacity_bytes",
                               64 * 1024 * 1024))
    except Exception:  # fall back to smallest (v7x per-TC) capacity
        vmem_cap = 64 * 1024 * 1024

    n_buffers = 3  # requested pipeline depth (falls back to 2 if unsupported)
    x_sz = jnp.dtype(x.dtype).itemsize
    y_sz = jnp.dtype(y.dtype).itemsize
    # Per-row VMEM cost: n_buffers pipelined copies of each input at its own
    # itemsize PLUS ~16 B/elem of in-kernel f32 temporaries (x_f32, y_f32,
    # exp(x-m), y*x) that the previous version did not account for.
    per_row_bytes = c_phys * (n_buffers * (x_sz + y_sz) + 16)

    if block_n is None:
        budget = min(40 * 1024 * 1024, int(0.6 * vmem_cap))
        block_n = budget // per_row_bytes
        block_n = max(8, min(block_n, max_block_n, _round_up(N, 8)))
        block_n = (block_n // 8) * 8
    assert block_n % 8 == 0 and block_n >= 8

    num_blocks = pl.cdiv(N, block_n)
    deep_pipeline = num_blocks >= 3

    vmem_need = block_n * per_row_bytes + n_buffers * block_n * 4  # + outputs
    vmem_limit = int(min(max(vmem_need + (8 << 20), 32 << 20),
                         int(0.85 * vmem_cap)))

    per_row_loss = pl.pallas_call(
        _soft_xent_kernel,
        out_shape=jax.ShapeDtypeStruct((N, 1), jnp.float32),
        grid=(num_blocks,),
        in_specs=[
            _make_in_spec((block_n, C), lambda i: (i, 0), deep_pipeline),
            _make_in_spec((block_n, C), lambda i: (i, 0), deep_pipeline),
        ],
        out_specs=pl.BlockSpec((block_n, 1), lambda i: (i, 0)),
        compiler_params=pltpu.CompilerParams(
            dimension_semantics=("parallel",),   # independent output blocks
            vmem_limit_bytes=vmem_limit,
        ),
        cost_estimate=pl.CostEstimate(
            flops=5 * N * C,
            transcendentals=N * C + N,
            bytes_accessed=N * C * (x_sz + y_sz) + N * 4,
        ),
    )(x, y)

    # Tiny final reduction + batch normalization in plain XLA; returned in f32
    # (no precision loss for bf16 callers).
    total = jnp.sum(per_row_loss, dtype=jnp.float32)
    return total / jnp.float32(N)


if __name__ == "__main__":
    key = jax.random.PRNGKey(0)
    kx, ky = jax.random.split(key)

    # Small (batch, num_classes) logits; soft labels rows sum to 1.
    N, C = 16, 32
    x = jax.random.normal(kx, (N, C), dtype=jnp.float32)
    y = jax.nn.softmax(jax.random.normal(ky, (N, C), dtype=jnp.float32), axis=-1)

    loss = jax.jit(soft_cross_entropy_loss)(x, y)
    loss = jax.block_until_ready(loss)
    ref = jnp.sum(-y * jax.nn.log_softmax(x, axis=-1)) / N
    assert jnp.allclose(loss, ref, rtol=1e-5, atol=1e-5), (loss, ref)

    # Also exercise the un-padded / ragged path: N not a multiple of 8,
    # C not a multiple of 128 (no wrapper-side padding anywhere).
    N2, C2 = 13, 100
    kx2, ky2 = jax.random.split(ky)
    x2 = jax.random.normal(kx2, (N2, C2), dtype=jnp.float32)
    y2 = jax.nn.softmax(jax.random.normal(ky2, (N2, C2), dtype=jnp.float32), axis=-1)
    loss2 = jax.block_until_ready(jax.jit(soft_cross_entropy_loss)(x2, y2))
    ref2 = jnp.sum(-y2 * jax.nn.log_softmax(x2, axis=-1)) / N2
    assert jnp.allclose(loss2, ref2, rtol=1e-5, atol=1e-5), (loss2, ref2)

    print("KERNEL_OK")
</pallas_src>

<mosaic_0001>
module attributes {stable_mosaic.version = 11 : i64} {
  func.func @_soft_xent_kernel(%arg0: i32, %arg1: memref<16x32xf32, #tpu.memory_space<vmem>>, %arg2: memref<16x32xf32, #tpu.memory_space<vmem>>, %arg3: memref<16x1xf32, #tpu.memory_space<vmem>>) attributes {dimension_semantics = [#tpu.dimension_semantics<parallel>], iteration_bounds = array<i64: 1>, scalar_prefetch = 0 : i64, scratch_operands = 0 : i64, tpu.core_type = #tpu.core_type<tc>, window_params = [{transform_indices = @transform_0, window_bounds = array<i64: 16, 32>}, {transform_indices = @transform_1, window_bounds = array<i64: 16, 32>}, {transform_indices = @transform_2, window_bounds = array<i64: 16, 1>}]} {
    %c0 = arith.constant 0 : index
    %c0_0 = arith.constant 0 : index
    %0 = vector.load %arg1[%c0, %c0_0] : memref<16x32xf32, #tpu.memory_space<vmem>>, vector<16x32xf32>
    %c0_1 = arith.constant 0 : index
    %c0_2 = arith.constant 0 : index
    %1 = vector.load %arg2[%c0_1, %c0_2] : memref<16x32xf32, #tpu.memory_space<vmem>>, vector<16x32xf32>
    %cst = arith.constant dense<0xFF800000> : vector<16xf32>
    %2 = vector.multi_reduction <maximumf>, %0, %cst [1] : vector<16x32xf32> to vector<16xf32>
    %3 = vector.shape_cast %2 : vector<16xf32> to vector<16x1xf32>
    %4 = vector.broadcast %3 : vector<16x1xf32> to vector<16x32xf32>
    %5 = arith.subf %0, %4 : vector<16x32xf32>
    %6 = math.exp %5 : vector<16x32xf32>
    %cst_3 = arith.constant dense<0.000000e+00> : vector<16xf32>
    %7 = vector.multi_reduction <add>, %6, %cst_3 [1] : vector<16x32xf32> to vector<16xf32>
    %8 = vector.shape_cast %7 : vector<16xf32> to vector<16x1xf32>
    %9 = math.log %8 : vector<16x1xf32>
    %cst_4 = arith.constant dense<0.000000e+00> : vector<16xf32>
    %10 = vector.multi_reduction <add>, %1, %cst_4 [1] : vector<16x32xf32> to vector<16xf32>
    %11 = vector.shape_cast %10 : vector<16xf32> to vector<16x1xf32>
    %12 = arith.mulf %1, %0 : vector<16x32xf32>
    %cst_5 = arith.constant dense<0.000000e+00> : vector<16xf32>
    %13 = vector.multi_reduction <add>, %12, %cst_5 [1] : vector<16x32xf32> to vector<16xf32>
    %14 = vector.shape_cast %13 : vector<16xf32> to vector<16x1xf32>
    %15 = arith.addf %3, %9 : vector<16x1xf32>
    %16 = arith.mulf %15, %11 : vector<16x1xf32>
    %17 = arith.subf %16, %14 : vector<16x1xf32>
    %c0_6 = arith.constant 0 : index
    %c0_7 = arith.constant 0 : index
    %18 = vector.load %arg3[%c0_6, %c0_7] : memref<16x1xf32, #tpu.memory_space<vmem>>, vector<16x1xf32>
    tpu.vector_store %arg3[%c0_6, %c0_7], %17 {strides = array<i32>} : memref<16x1xf32, #tpu.memory_space<vmem>>, vector<16x1xf32>,
    return
  }
  func.func @transform_0(%arg0: i32) -> (i32, i32) {
    %c0_i32 = arith.constant 0 : i32
    %c0_i32_0 = arith.constant 0 : i32
    return %arg0, %c0_i32 : i32, i32
  }
  func.func @transform_1(%arg0: i32) -> (i32, i32) {
    %c0_i32 = arith.constant 0 : i32
    %c0_i32_0 = arith.constant 0 : i32
    return %arg0, %c0_i32 : i32, i32
  }
  func.func @transform_2(%arg0: i32) -> (i32, i32) {
    %c0_i32 = arith.constant 0 : i32
    %c0_i32_0 = arith.constant 0 : i32
    return %arg0, %c0_i32 : i32, i32
  }
}

</mosaic_0001>

<bundles_post_ra>
// kernel: soft_cross_entropy_loss.1
= control target key start
LH: loop header
LB: loop body
LE: loop exit
PB: predicated region body
PF: predicated region fallthrough
CT: control target
= control target key end

     0   :  { %7 = vsyncpa [#allocation3], 0  ;;  %s202_s0 = inlined_call_operand.hbm [shape: f32[16,32], index: 0, kind: input, shape index: {}]   ;;  %s203_s1 = inlined_call_operand.hbm [shape: f32[16,32], index: 1, kind: input, shape index: {}]   ;;  %s204_s2 = inlined_call_operand.vmem [shape: f32[16,1], index: 2, kind: output, shape index: {}]  }
   0x1   :  { %s13_s11 = sshll.u32 %s202_s0, 4  ;;  %s14_s11 = int_to_ptr.hbm [resolvable:$true] %s13_s11 }
   0x2   :  { %8 = vsyncpa [#allocation5], 0  ;;  %s163_s12 = smov [#allocation2]   ;;  %s26_s16 = sshll.u32 %s203_s1, 4  ;;  %s27_s16 = int_to_ptr.hbm [resolvable:$true] %s26_s16 }
   0x3   :  { %s15_s13 = sshll.u32 %s163_s12, 4  ;;  %s164_s17 = smov 128   ;;  %s16_s13 = int_to_ptr.vmem [resolvable:$true] %s15_s13 }
   0x4   :  { %s165_s18 = smov 8   ;;  %s166_s19 = smov [#allocation4]  }
   0x5   :  { %21 = dma.hbm_to_vmem [thread:$0]  %s14_s11, 256, %s16_s13, [#allocation3], %s164_s17, %s164_s17, %s165_s18  }
   0x6   :  { %s28_s20 = sshll.u32 %s166_s19, 4  ;;  %s29_s20 = int_to_ptr.vmem [resolvable:$true] %s28_s20 }
   0x7   :  { %34 = dma.hbm_to_vmem [thread:$0]  %s27_s16, 256, %s29_s20, [#allocation5], %s164_s17, %s164_s17, %s165_s18  }
   0x8   :  { %159 = dma.done.wait [#allocation3], 256  }
   0x9   :  { %160 = vsyncadd [#allocation3], 4294967040 }
   0xa   :  { %161 = dma.done.wait [#allocation5], 256  }
   0xb   :  { %162 = vsyncadd [#allocation5], 4294967040  ;;  %vm47_vm0 = vcmask 261120   ;;  %v43_v0 = vld [vmem:[#allocation2] sm:$0xff]  ;;  %v44_v2 = vld [vmem:[#allocation2 + $0x8] sm:$0xff]  ;;  %vm90_vm1 = vcmask 7168  }
   0xc   :  { %v48_v1 = vsel %vm47_vm0, %v43_v0, -inf  ;;  %v51_v3 = vsel %vm47_vm0, %v44_v2, -inf  ;;  %v45_v4 = vld [vmem:[#allocation4] sm:$0xff]  ;;  %v46_v8 = vld [vmem:[#allocation4 + $0x8] sm:$0xff] }
   0xd   :  { %49 = vmax.xlane.f32.xlu0 %v48_v1  ;;  %v70_v5 = vsel %vm47_vm0, %v45_v4, 0.0  ;;  %v76_v6 = vmul.f32 %v45_v4, %v43_v0  ;;  %v73_v9 = vsel %vm47_vm0, %v46_v8, 0.0  ;;  %v77_v20 = vmul.f32 %v46_v8, %v44_v2 }
   0xe   :  { %71 = vadd.xlane.f32.xlu2 %v70_v5 }
   0xf   :  { %v78_v7 = vsel %vm47_vm0, %v76_v6, 0.0  ;;  %v81_v21 = vsel %vm47_vm0, %v77_v20, 0.0 }
  0x15   :  { %52 = vmax.xlane.f32.xlu0 %v51_v3 }
  0x16   :  { %74 = vadd.xlane.f32.xlu2 %v73_v9 }
  0x1d   :  { %79 = vadd.xlane.f32.xlu0 %v78_v7 }
  0x80   :  { %v50_v10 = vpop.xlane.xlu0 %49 }
  0x81   :  { %v54_v11 = vsub.f32 %v43_v0, %v50_v10  ;;  %v72_v24 = vpop.xlane.xlu2 %71 }
  0x83   :  { %v56_v12 = vmul.f32 1.442695, %v54_v11 }
  0x85   :  { %103 = vpow2.f32 %v56_v12 }
  0x88   :  { %v53_v13 = vpop.xlane.xlu0 %52 }
  0x89   :  { %v55_v14 = vsub.f32 %v44_v2, %v53_v13  ;;  %v75_v33 = vpop.xlane.xlu2 %74 }
  0x8b   :  { %v104_v15 = vpop.eup %103  ;;  %v58_v16 = vmul.f32 1.442695, %v55_v14 }
  0x8c   :  { %v60_v17 = vsel %vm47_vm0, %v104_v15, 0.0 }
  0x8d   :  { %105 = vpow2.f32 %v58_v16  ;;  %61 = vadd.xlane.f32.xlu1 %v60_v17 }
  0x90   :  { %v80_v28 = vpop.xlane.xlu0 %79 }
  0x93   :  { %v106_v18 = vpop.eup %105 }
  0x94   :  { %v63_v19 = vsel %vm47_vm0, %v106_v18, 0.0 }
  0x95   :  { %64 = vadd.xlane.f32.xlu1 %v63_v19 }
  0x9d   :  { %82 = vadd.xlane.f32.xlu1 %v81_v21 }
 0x100   :  { %v62_v22 = vpop.xlane.xlu1 %61 }
 0x101   :  { %107 = vlog2.f32 %v62_v22 }
 0x107   :  { %v108_v23 = vpop.eup %107 }
 0x108   :  { %v67_v25 = vmul.f32 0.6931472, %v108_v23  ;;  %v65_v26 = vpop.xlane.xlu1 %64 }
 0x109   :  { %109 = vlog2.f32 %v65_v26 }
 0x10a   :  { %v84_v27 = vadd.f32 %v67_v25, %v50_v10 }
 0x10c   :  { %v86_v29 = vmul.f32 %v84_v27, %v72_v24 }
 0x10e   :  { %v88_v30 = vsub.f32 %v86_v29, %v80_v28 }
 0x10f   :  { %v110_v31 = vpop.eup %109 }
 0x110   :  { %v69_v32 = vmul.f32 0.6931472, %v110_v31  ;;  %91 = vst.msk [vmem:[%s204_s2] sm:$0xff] %vm90_vm1, %v88_v30  ;;  %v83_v35 = vpop.xlane.xlu1 %82 }
 0x112   :  { %v85_v34 = vadd.f32 %v69_v32, %v53_v13 }
 0x114   :  { %v87_v36 = vmul.f32 %v85_v34, %v75_v33 }
 0x116   :  { %v89_v37 = vsub.f32 %v87_v36, %v83_v35 }
 0x118   :  { %92 = vst.msk [vmem:[%s204_s2 + $0x8] sm:$0xff] %vm90_vm1, %v89_v37 }
 0x119   :  { %97 = vsyncpa [#allocation3], 1 }
 0x11a   :  { %98 = vsyncpa [#allocation5], 1 }

</bundles_post_ra>
